<compile_context>
chip_gen: v7x
topology: tpu7x:2x2x1
jax: 0.10.0
libtpu: 0.0.40
codegen_flags: <defaults>
</compile_context>

<pallas_src>
import jax
import jax.numpy as jnp
from jax.experimental import pallas as pl
from jax.experimental.pallas import tpu as pltpu

LAYER_SIZES = [56, 256, 128, 64, 32, 1]
IN_FEATURES = LAYER_SIZES[0]
DEFAULT_TILE_B = 4096       # ~8-10 MiB of live per-tile activations -> well under VMEM


def _round_up(n, m):
    return ((n + m - 1) // m) * m


def _choose_tile(B, tile_b):
    """Pick the batch tile (multiple of 128) and the padded batch size."""
    B = max(int(B), 1)
    if tile_b is None:
        if B <= DEFAULT_TILE_B:
            tile_b = _round_up(B, 128)                         # single tile covers B
        else:
            # Large batch: large tiles to amortize grid-step overhead and MXU
            # weight reloads, but keep >= 2 grid steps so ("parallel",) can
            # shard across v7x's two TensorCores.
            tile_b = min(DEFAULT_TILE_B, _round_up(pl.cdiv(B, 2), 1024))
    else:
        tile_b = max(128, _round_up(int(tile_b), 128))
    B_pad = _round_up(B, tile_b)
    if B_pad > tile_b:
        # Multi-step grid: the lane-dense (tile_b//128, 128) output block needs
        # its sublane dim to be a multiple of 8 -> round the tile to 1024.
        tile_b = _round_up(tile_b, 1024)
        B_pad = _round_up(B, tile_b)
    return tile_b, B_pad


def mlp_kernel(x_ref,
               w1_ref, b1_ref,
               w2_ref, b2_ref,
               w3_ref, b3_ref,
               w4_ref, b4_ref,
               w5r_ref, b5_ref,
               o_ref):
    """One batch tile of the 5-layer MLP. Weights stay VMEM-resident across tiles."""
    cdt = w1_ref.dtype  # matmul / activation dtype (bf16 for throughput, f32 for checking)

    # Layer 1: 56 -> 256.  Input cast to the matmul dtype in-kernel (cheap VPU
    # work hidden under the MXU); f32 MXU accumulation; bias-add + ReLU in the
    # compute dtype (bf16 halves VALU work on v6e/v7x; f32 path stays bit-exact).
    h = jnp.dot(x_ref[...].astype(cdt), w1_ref[...],
                preferred_element_type=jnp.float32)
    h = jnp.maximum(h.astype(cdt) + b1_ref[...], 0)
    # Layer 2: 256 -> 128
    h = jnp.dot(h, w2_ref[...], preferred_element_type=jnp.float32)
    h = jnp.maximum(h.astype(cdt) + b2_ref[...], 0)
    # Layer 3: 128 -> 64
    h = jnp.dot(h, w3_ref[...], preferred_element_type=jnp.float32)
    h = jnp.maximum(h.astype(cdt) + b3_ref[...], 0)
    # Layer 4: 64 -> 32
    h = jnp.dot(h, w4_ref[...], preferred_element_type=jnp.float32)
    h = jnp.maximum(h.astype(cdt) + b4_ref[...], 0)
    # Layer 5: 32 -> 1.  An N=1 MXU matmul wastes a full pass; VPU multiply +
    # XLU lane-reduction rides otherwise-idle slots.  Reshape the per-row logits
    # into a lane-dense (tile_b//128, 128) slab so the writeback uses full,
    # unmasked vector stores (the small sublane->lane relayout rides the XLU).
    logits = jnp.sum(h.astype(jnp.float32) * w5r_ref[...], axis=-1)
    o_ref[...] = (logits.reshape(o_ref.shape) + b5_ref[...]).astype(o_ref.dtype)


def init_params(key):
    """torch.nn.Linear-style init (uniform(-1/sqrt(fan_in), 1/sqrt(fan_in))).
    Weights stored as (in, out) so the kernel computes y = x @ W + b."""
    params = []
    for fan_in, fan_out in zip(LAYER_SIZES[:-1], LAYER_SIZES[1:]):
        key, kw, kb = jax.random.split(key, 3)
        bound = 1.0 / jnp.sqrt(jnp.float32(fan_in))
        w = jax.random.uniform(kw, (fan_in, fan_out), jnp.float32, -bound, bound)
        b = jax.random.uniform(kb, (1, fan_out), jnp.float32, -bound, bound)
        params.append((w, b))
    return params


def forward(x, params, *, compute_dtype=jnp.bfloat16, tile_b=None):
    """x: (B, ...) with prod(...) == 56. Flatten (glue) + batch-tiled Pallas MLP.

    bf16 matmul/activation dtype (f32 MXU accumulation) is the right default on
    v5e/v6e/v7x alike; compute_dtype=float32 is for bit-exact checking only.
    """
    B = x.shape[0]
    x_flat = x.reshape(B, -1).astype(jnp.float32)        # nn.Flatten
    assert x_flat.shape[1] == IN_FEATURES

    tile_b, B_pad = _choose_tile(B, tile_b)
    grid = B_pad // tile_b

    # Only pad the batch when needed (no padded feature copy, no wrapper cast:
    # the kernel reads the raw f32 rows and casts in VMEM).
    if B_pad != B:
        x_flat = jnp.pad(x_flat, ((0, B_pad - B), (0, 0)))

    (w1, b1), (w2, b2), (w3, b3), (w4, b4), (w5, b5) = params
    cdt = compute_dtype
    mm = [(w1.astype(cdt), b1.astype(cdt)),
          (w2.astype(cdt), b2.astype(cdt)),
          (w3.astype(cdt), b3.astype(cdt)),
          (w4.astype(cdt), b4.astype(cdt))]
    w5_row = w5.reshape(1, LAYER_SIZES[4]).astype(jnp.float32)   # (1, 32), VPU head
    b5_f = b5.reshape(1, 1).astype(jnp.float32)

    operands = [x_flat]
    for w, b in mm:
        operands += [w, b]
    operands += [w5_row, b5_f]

    def resident(shape):
        # Constant block index -> weight/bias stays VMEM-resident, no re-DMA.
        return pl.BlockSpec(shape, lambda i: (0, 0))

    in_specs = [pl.BlockSpec((tile_b, IN_FEATURES), lambda i: (i, 0))]
    in_specs += [resident(op.shape) for op in operands[1:]]
    # Lane-dense output: (tile_b//128, 128) blocks of a (B_pad//128, 128) array.
    out_specs = pl.BlockSpec((tile_b // 128, 128), lambda i: (i, 0))

    flops = 2 * B_pad * sum(a * b for a, b in zip(LAYER_SIZES[:-1], LAYER_SIZES[1:]))
    bytes_accessed = int(
        x_flat.size * x_flat.dtype.itemsize
        + sum(int(op.size) * op.dtype.itemsize for op in operands[1:])
        + B_pad * 4)
    cost = pl.CostEstimate(flops=flops, transcendentals=0, bytes_accessed=bytes_accessed)

    # <= 48 MiB is safe on every generation incl. v7x (64 MiB physical VMEM);
    # tiles > 4096 rows are intended for v5e/v6e (128 MiB physical) only.
    vmem_limit = 48 * 1024 * 1024 if tile_b <= 4096 else 96 * 1024 * 1024

    out = pl.pallas_call(
        mlp_kernel,
        out_shape=jax.ShapeDtypeStruct((B_pad // 128, 128), jnp.float32),
        grid=(grid,),
        in_specs=in_specs,
        out_specs=out_specs,
        compiler_params=pltpu.CompilerParams(
            dimension_semantics=("parallel",),       # megacore / v7x 2-TC sharding
            vmem_limit_bytes=vmem_limit,
        ),
        cost_estimate=cost,
    )(*operands)
    # Row-major (B_pad//128, 128) <-> (B_pad, 1): cheap reshape + slice.
    return out.reshape(B_pad, 1)[:B]


def forward_ref(x, params):
    """Pure-JAX f32 reference for correctness checking."""
    h = x.reshape(x.shape[0], -1).astype(jnp.float32)
    for i, (w, b) in enumerate(params):
        h = h @ w + b
        if i < len(params) - 1:
            h = jnp.maximum(h, 0.0)
    return h


if __name__ == "__main__":
    key = jax.random.PRNGKey(0)
    key_x, key_x2, key_x3, key_p = jax.random.split(key, 4)

    params = init_params(key_p)

    # Small deterministic input: (batch=2, 7, 8) -> flattens to (2, 56).
    x = jax.random.normal(key_x, (2, 7, 8), dtype=jnp.float32)
    ref = forward_ref(x, params)

    # f32 compute path: tight check.
    out_f32 = jax.block_until_ready(forward(x, params, compute_dtype=jnp.float32))
    assert out_f32.shape == (2, 1), out_f32.shape
    assert jnp.allclose(out_f32, ref, atol=1e-4, rtol=1e-4), (out_f32, ref)

    # Default bf16 matmul/activation path: looser check vs f32 reference.
    out_bf16 = jax.block_until_ready(forward(x, params))
    assert out_bf16.shape == (2, 1), out_bf16.shape
    assert jnp.allclose(out_bf16, ref, atol=5e-2, rtol=5e-2), (out_bf16, ref)

    # Batch-padding path (B not a multiple of 128; tile rounds 16 -> 128).
    x2 = jax.random.normal(key_x2, (37, 7, 8), dtype=jnp.float32)
    ref2 = forward_ref(x2, params)
    out2 = jax.block_until_ready(
        forward(x2, params, compute_dtype=jnp.float32, tile_b=16))
    assert out2.shape == (37, 1), out2.shape
    assert jnp.allclose(out2, ref2, atol=1e-4, rtol=1e-4), (out2, ref2)

    # Multi-step grid path (grid=2, (8,128) lane-dense output blocks).
    x3 = jax.random.normal(key_x3, (1025, 56), dtype=jnp.float32)
    ref3 = forward_ref(x3, params)
    out3 = jax.block_until_ready(
        forward(x3, params, compute_dtype=jnp.float32, tile_b=1024))
    assert out3.shape == (1025, 1), out3.shape
    assert jnp.allclose(out3, ref3, atol=1e-4, rtol=1e-4), (out3, ref3)

    print("KERNEL_OK")
</pallas_src>

<mosaic_0001>
module attributes {stable_mosaic.version = 11 : i64} {
  func.func @mlp_kernel(%arg0: i32, %arg1: memref<128x56xf32, #tpu.memory_space<vmem>>, %arg2: memref<56x256xf32, #tpu.memory_space<vmem>>, %arg3: memref<1x256xf32, #tpu.memory_space<vmem>>, %arg4: memref<256x128xf32, #tpu.memory_space<vmem>>, %arg5: memref<1x128xf32, #tpu.memory_space<vmem>>, %arg6: memref<128x64xf32, #tpu.memory_space<vmem>>, %arg7: memref<1x64xf32, #tpu.memory_space<vmem>>, %arg8: memref<64x32xf32, #tpu.memory_space<vmem>>, %arg9: memref<1x32xf32, #tpu.memory_space<vmem>>, %arg10: memref<1x32xf32, #tpu.memory_space<vmem>>, %arg11: memref<1x1xf32, #tpu.memory_space<vmem>>, %arg12: memref<1x128xf32, #tpu.memory_space<vmem>>) attributes {dimension_semantics = [#tpu.dimension_semantics<parallel>], iteration_bounds = array<i64: 1>, scalar_prefetch = 0 : i64, scratch_operands = 0 : i64, tpu.core_type = #tpu.core_type<tc>, window_params = [{transform_indices = @transform_0, window_bounds = array<i64: 128, 56>}, {pipeline_mode = #tpu.pipeline_mode<synchronous>, transform_indices = @transform_1, window_bounds = array<i64: 56, 256>}, {pipeline_mode = #tpu.pipeline_mode<synchronous>, transform_indices = @transform_2, window_bounds = array<i64: 1, 256>}, {pipeline_mode = #tpu.pipeline_mode<synchronous>, transform_indices = @transform_3, window_bounds = array<i64: 256, 128>}, {pipeline_mode = #tpu.pipeline_mode<synchronous>, transform_indices = @transform_4, window_bounds = array<i64: 1, 128>}, {pipeline_mode = #tpu.pipeline_mode<synchronous>, transform_indices = @transform_5, window_bounds = array<i64: 128, 64>}, {pipeline_mode = #tpu.pipeline_mode<synchronous>, transform_indices = @transform_6, window_bounds = array<i64: 1, 64>}, {pipeline_mode = #tpu.pipeline_mode<synchronous>, transform_indices = @transform_7, window_bounds = array<i64: 64, 32>}, {pipeline_mode = #tpu.pipeline_mode<synchronous>, transform_indices = @transform_8, window_bounds = array<i64: 1, 32>}, {pipeline_mode = #tpu.pipeline_mode<synchronous>, transform_indices = @transform_9, window_bounds = array<i64: 1, 32>}, {pipeline_mode = #tpu.pipeline_mode<synchronous>, transform_indices = @transform_10, window_bounds = array<i64: 1, 1>}, {transform_indices = @transform_11, window_bounds = array<i64: 1, 128>}]} {
    %c0 = arith.constant 0 : index
    %c0_0 = arith.constant 0 : index
    %0 = vector.load %arg1[%c0, %c0_0] : memref<128x56xf32, #tpu.memory_space<vmem>>, vector<128x56xf32>
    %c0_1 = arith.constant 0 : index
    %c0_2 = arith.constant 0 : index
    %1 = vector.load %arg2[%c0_1, %c0_2] : memref<56x256xf32, #tpu.memory_space<vmem>>, vector<56x256xf32>
    %cst = arith.constant dense<0.000000e+00> : vector<128x256xf32>
    %2 = tpu.matmul %0, %1, %cst {dimension_numbers = #tpu.dot_dimension_numbers<[1], [0], [0], [1], [0, 0, 1, 1], [], []>} : vector<128x56xf32>, vector<56x256xf32>, vector<128x256xf32> -> vector<128x256xf32>
    %c0_3 = arith.constant 0 : index
    %c0_4 = arith.constant 0 : index
    %3 = vector.load %arg3[%c0_3, %c0_4] : memref<1x256xf32, #tpu.memory_space<vmem>>, vector<1x256xf32>
    %4 = vector.broadcast %3 : vector<1x256xf32> to vector<128x256xf32>
    %5 = arith.addf %2, %4 : vector<128x256xf32>
    %cst_5 = arith.constant 0.000000e+00 : f32
    %6 = vector.broadcast %cst_5 : f32 to vector<128x256xf32>
    %7 = arith.maximumf %5, %6 : vector<128x256xf32>
    %c0_6 = arith.constant 0 : index
    %c0_7 = arith.constant 0 : index
    %8 = vector.load %arg4[%c0_6, %c0_7] : memref<256x128xf32, #tpu.memory_space<vmem>>, vector<256x128xf32>
    %cst_8 = arith.constant dense<0.000000e+00> : vector<128x128xf32>
    %9 = tpu.matmul %7, %8, %cst_8 {dimension_numbers = #tpu.dot_dimension_numbers<[1], [0], [0], [1], [0, 0, 1, 1], [], []>} : vector<128x256xf32>, vector<256x128xf32>, vector<128x128xf32> -> vector<128x128xf32>
    %c0_9 = arith.constant 0 : index
    %c0_10 = arith.constant 0 : index
    %10 = vector.load %arg5[%c0_9, %c0_10] : memref<1x128xf32, #tpu.memory_space<vmem>>, vector<1x128xf32>
    %11 = vector.broadcast %10 : vector<1x128xf32> to vector<128x128xf32>
    %12 = arith.addf %9, %11 : vector<128x128xf32>
    %cst_11 = arith.constant 0.000000e+00 : f32
    %13 = vector.broadcast %cst_11 : f32 to vector<128x128xf32>
    %14 = arith.maximumf %12, %13 : vector<128x128xf32>
    %c0_12 = arith.constant 0 : index
    %c0_13 = arith.constant 0 : index
    %15 = vector.load %arg6[%c0_12, %c0_13] : memref<128x64xf32, #tpu.memory_space<vmem>>, vector<128x64xf32>
    %cst_14 = arith.constant dense<0.000000e+00> : vector<128x64xf32>
    %16 = tpu.matmul %14, %15, %cst_14 {dimension_numbers = #tpu.dot_dimension_numbers<[1], [0], [0], [1], [0, 0, 1, 1], [], []>} : vector<128x128xf32>, vector<128x64xf32>, vector<128x64xf32> -> vector<128x64xf32>
    %c0_15 = arith.constant 0 : index
    %c0_16 = arith.constant 0 : index
    %17 = vector.load %arg7[%c0_15, %c0_16] : memref<1x64xf32, #tpu.memory_space<vmem>>, vector<1x64xf32>
    %18 = vector.broadcast %17 : vector<1x64xf32> to vector<128x64xf32>
    %19 = arith.addf %16, %18 : vector<128x64xf32>
    %cst_17 = arith.constant 0.000000e+00 : f32
    %20 = vector.broadcast %cst_17 : f32 to vector<128x64xf32>
    %21 = arith.maximumf %19, %20 : vector<128x64xf32>
    %c0_18 = arith.constant 0 : index
    %c0_19 = arith.constant 0 : index
    %22 = vector.load %arg8[%c0_18, %c0_19] : memref<64x32xf32, #tpu.memory_space<vmem>>, vector<64x32xf32>
    %cst_20 = arith.constant dense<0.000000e+00> : vector<128x32xf32>
    %23 = tpu.matmul %21, %22, %cst_20 {dimension_numbers = #tpu.dot_dimension_numbers<[1], [0], [0], [1], [0, 0, 1, 1], [], []>} : vector<128x64xf32>, vector<64x32xf32>, vector<128x32xf32> -> vector<128x32xf32>
    %c0_21 = arith.constant 0 : index
    %c0_22 = arith.constant 0 : index
    %24 = vector.load %arg9[%c0_21, %c0_22] : memref<1x32xf32, #tpu.memory_space<vmem>>, vector<1x32xf32>
    %25 = vector.broadcast %24 : vector<1x32xf32> to vector<128x32xf32>
    %26 = arith.addf %23, %25 : vector<128x32xf32>
    %cst_23 = arith.constant 0.000000e+00 : f32
    %27 = vector.broadcast %cst_23 : f32 to vector<128x32xf32>
    %28 = arith.maximumf %26, %27 : vector<128x32xf32>
    %c0_24 = arith.constant 0 : index
    %c0_25 = arith.constant 0 : index
    %29 = vector.load %arg10[%c0_24, %c0_25] : memref<1x32xf32, #tpu.memory_space<vmem>>, vector<1x32xf32>
    %30 = vector.broadcast %29 : vector<1x32xf32> to vector<128x32xf32>
    %31 = arith.mulf %28, %30 : vector<128x32xf32>
    %cst_26 = arith.constant dense<0.000000e+00> : vector<128xf32>
    %32 = vector.multi_reduction <add>, %31, %cst_26 [1] : vector<128x32xf32> to vector<128xf32>
    %33 = vector.shape_cast %32 : vector<128xf32> to vector<1x128xf32>
    %c0_27 = arith.constant 0 : index
    %c0_28 = arith.constant 0 : index
    %34 = vector.load %arg11[%c0_27, %c0_28] : memref<1x1xf32, #tpu.memory_space<vmem>>, vector<1x1xf32>
    %35 = vector.broadcast %34 : vector<1x1xf32> to vector<1x128xf32>
    %36 = arith.addf %33, %35 : vector<1x128xf32>
    %c0_29 = arith.constant 0 : index
    %c0_30 = arith.constant 0 : index
    %37 = vector.load %arg12[%c0_29, %c0_30] : memref<1x128xf32, #tpu.memory_space<vmem>>, vector<1x128xf32>
    tpu.vector_store %arg12[%c0_29, %c0_30], %36 {strides = array<i32>} : memref<1x128xf32, #tpu.memory_space<vmem>>, vector<1x128xf32>,
    return
  }
  func.func @transform_0(%arg0: i32) -> (i32, i32) {
    %c0_i32 = arith.constant 0 : i32
    %c0_i32_0 = arith.constant 0 : i32
    return %arg0, %c0_i32 : i32, i32
  }
  func.func @transform_1(%arg0: i32) -> (i32, i32) {
    %c0_i32 = arith.constant 0 : i32
    %c0_i32_0 = arith.constant 0 : i32
    %c0_i32_1 = arith.constant 0 : i32
    return %c0_i32, %c0_i32_0 : i32, i32
  }
  func.func @transform_2(%arg0: i32) -> (i32, i32) {
    %c0_i32 = arith.constant 0 : i32
    %c0_i32_0 = arith.constant 0 : i32
    %c0_i32_1 = arith.constant 0 : i32
    return %c0_i32, %c0_i32_0 : i32, i32
  }
  func.func @transform_3(%arg0: i32) -> (i32, i32) {
    %c0_i32 = arith.constant 0 : i32
    %c0_i32_0 = arith.constant 0 : i32
    %c0_i32_1 = arith.constant 0 : i32
    return %c0_i32, %c0_i32_0 : i32, i32
  }
  func.func @transform_4(%arg0: i32) -> (i32, i32) {
    %c0_i32 = arith.constant 0 : i32
    %c0_i32_0 = arith.constant 0 : i32
    %c0_i32_1 = arith.constant 0 : i32
    return %c0_i32, %c0_i32_0 : i32, i32
  }
  func.func @transform_5(%arg0: i32) -> (i32, i32) {
    %c0_i32 = arith.constant 0 : i32
    %c0_i32_0 = arith.constant 0 : i32
    %c0_i32_1 = arith.constant 0 : i32
    return %c0_i32, %c0_i32_0 : i32, i32
  }
  func.func @transform_6(%arg0: i32) -> (i32, i32) {
    %c0_i32 = arith.constant 0 : i32
    %c0_i32_0 = arith.constant 0 : i32
    %c0_i32_1 = arith.constant 0 : i32
    return %c0_i32, %c0_i32_0 : i32, i32
  }
  func.func @transform_7(%arg0: i32) -> (i32, i32) {
    %c0_i32 = arith.constant 0 : i32
    %c0_i32_0 = arith.constant 0 : i32
    %c0_i32_1 = arith.constant 0 : i32
    return %c0_i32, %c0_i32_0 : i32, i32
  }
  func.func @transform_8(%arg0: i32) -> (i32, i32) {
    %c0_i32 = arith.constant 0 : i32
    %c0_i32_0 = arith.constant 0 : i32
    %c0_i32_1 = arith.constant 0 : i32
    return %c0_i32, %c0_i32_0 : i32, i32
  }
  func.func @transform_9(%arg0: i32) -> (i32, i32) {
    %c0_i32 = arith.constant 0 : i32
    %c0_i32_0 = arith.constant 0 : i32
    %c0_i32_1 = arith.constant 0 : i32
    return %c0_i32, %c0_i32_0 : i32, i32
  }
  func.func @transform_10(%arg0: i32) -> (i32, i32) {
    %c0_i32 = arith.constant 0 : i32
    %c0_i32_0 = arith.constant 0 : i32
    %c0_i32_1 = arith.constant 0 : i32
    return %c0_i32, %c0_i32_0 : i32, i32
  }
  func.func @transform_11(%arg0: i32) -> (i32, i32) {
    %c0_i32 = arith.constant 0 : i32
    %c0_i32_0 = arith.constant 0 : i32
    return %arg0, %c0_i32 : i32, i32
  }
}

</mosaic_0001>

<bundles_post_ra>
// kernel: tpu_custom_call.1
= control target key start
LH: loop header
LB: loop body
LE: loop exit
PB: predicated region body
PF: predicated region fallthrough
CT: control target
= control target key end

     0   :  { %s2141_s0 = inlined_call_operand.vmem [shape: f32[128,56], index: 0, kind: input, shape index: {}]   ;;  %s2142_s1 = inlined_call_operand.vmem [shape: f32[56,256], index: 1, kind: input, shape index: {}]   ;;  %s2143_s2 = inlined_call_operand.vmem [shape: f32[1,256], index: 2, kind: input, shape index: {}]   ;;  %s2144_s3 = inlined_call_operand.vmem [shape: f32[256,128], index: 3, kind: input, shape index: {}]   ;;  %s2145_s4 = inlined_call_operand.vmem [shape: f32[1,128], index: 4, kind: input, shape index: {}]   ;;  %s2146_s5 = inlined_call_operand.vmem [shape: f32[128,64], index: 5, kind: input, shape index: {}]   ;;  %s2147_s6 = inlined_call_operand.vmem [shape: f32[1,64], index: 6, kind: input, shape index: {}]   ;;  %s2148_s7 = inlined_call_operand.vmem [shape: f32[64,32], index: 7, kind: input, shape index: {}]   ;;  %s2149_s8 = inlined_call_operand.vmem [shape: f32[1,32], index: 8, kind: input, shape index: {}]   ;;  %s2150_s9 = inlined_call_operand.vmem [shape: f32[1,32], index: 9, kind: input, shape index: {}]   ;;  %s2151_s10 = inlined_call_operand.<no memory space> [shape: f32[1,1], index: 10, kind: input, shape index: {}]   ;;  %s2152_s11 = inlined_call_operand.hbm [shape: f32[1,128], index: 11, kind: output, shape index: {}]  }
   0x1   :  { %v16_v0 = vstv %s2151_s10 }
   0x2   :  { %17 = vst [vmem:[#allocation2] sm:$0x1] %v16_v0 }
   0x3   :  { %v58_v1 = vld [vmem:[%s2142_s1 + $0x8] sm:$0xff]  ;;  %v60_v2 = vld [vmem:[%s2142_s1 + $0x18] sm:$0xff]  ;;  %v57_v3 = vld [vmem:[%s2142_s1] sm:$0xff]  ;;  %v1572_v8 = vmov 0.0   ;;  %vm83_vm0 = vcmask 457728  }
   0x4   :  { %v1443_v4 = vpack.c.bf16 %v60_v2, %v58_v1  ;;  %v59_v5 = vld [vmem:[%s2142_s1 + $0x10] sm:$0xff]  ;;  %v62_v6 = vld [vmem:[%s2142_s1 + $0x28] sm:$0xff]  ;;  %v64_v7 = vld [vmem:[%s2142_s1 + $0x38] sm:$0xff]  ;;  %196 = vmatprep.mubr.f32.mxu0 %v1572_v8 }
   0x5   :  { %v1445_v9 = vpack.c.bf16 %v59_v5, %v57_v3  ;;  %v1447_v10 = vpack.c.bf16 %v64_v7, %v62_v6  ;;  %v61_v11 = vld [vmem:[%s2142_s1 + $0x20] sm:$0xff]  ;;  %v63_v12 = vld [vmem:[%s2142_s1 + $0x30] sm:$0xff]  ;;  %v66_v13 = vld [vmem:[%s2142_s1 + $0x48] sm:$0xff] }
   0x6   :  { %1444 = vmatprep.subr.bf16.mxu0 %v1443_v4  ;;  %v68_v14 = vld [vmem:[%s2142_s1 + $0x58] sm:$0xff]  ;;  %v1449_v15 = vpack.c.bf16 %v63_v12, %v61_v11  ;;  %v65_v17 = vld [vmem:[%s2142_s1 + $0x40] sm:$0xff]  ;;  %v67_v18 = vld [vmem:[%s2142_s1 + $0x50] sm:$0xff] }
   0x7   :  { %1446 = vmatpush1.bf16.msra.mxu0 %v1445_v9  ;;  %v1451_v16 = vpack.c.bf16 %v68_v14, %v66_v13  ;;  %v1453_v19 = vpack.c.bf16 %v67_v18, %v65_v17  ;;  %v70_v20 = vld [vmem:[%s2142_s1 + $0x68] sm:$0xff]  ;;  %v341_v21 = vld [vmem:[%s2144_s3 + $0x80] sm:$0xff]  ;;  %v343_v26 = vld [vmem:[%s2144_s3 + $0x90] sm:$0xff] }
   0x8   :  { %1448 = vmatprep.subr.bf16.mxu0 %v1447_v10  ;;  %v342_v22 = vld [vmem:[%s2144_s3 + $0x88] sm:$0xff]  ;;  %v325_v23 = vld [vmem:[%s2144_s3] sm:$0xff]  ;;  %v344_v27 = vld [vmem:[%s2144_s3 + $0x98] sm:$0xff] }
   0x9   :  { %v1455_v24 = vpack.c.bf16 %v342_v22, %v341_v21  ;;  %v326_v25 = vld [vmem:[%s2144_s3 + $0x8] sm:$0xff]  ;;  %v1459_v29 = vpack.c.bf16 %v344_v27, %v343_v26  ;;  %v327_v30 = vld [vmem:[%s2144_s3 + $0x10] sm:$0xff]  ;;  %v328_v31 = vld [vmem:[%s2144_s3 + $0x18] sm:$0xff] }
   0xa   :  { %v1457_v28 = vpack.c.bf16 %v326_v25, %v325_v23  ;;  %v345_v32 = vld [vmem:[%s2144_s3 + $0xa0] sm:$0xff]  ;;  %v346_v34 = vld [vmem:[%s2144_s3 + $0xa8] sm:$0xff]  ;;  %v1461_v36 = vpack.c.bf16 %v328_v31, %v327_v30  ;;  %v347_v40 = vld [vmem:[%s2144_s3 + $0xb0] sm:$0xff] }
   0xb   :  { %1450 = vmatpush1.bf16.msra.mxu0 %v1449_v15  ;;  %v69_v33 = vld [vmem:[%s2142_s1 + $0x60] sm:$0xff]  ;;  %1456 = vmatprep.subr.bf16.mxu1 %v1455_v24  ;;  %v1463_v37 = vpack.c.bf16 %v346_v34, %v345_v32  ;;  %v330_v39 = vld [vmem:[%s2144_s3 + $0x28] sm:$0xff]  ;;  %v348_v41 = vld [vmem:[%s2144_s3 + $0xb8] sm:$0xff] }
   0xc   :  { %1452 = vmatprep.subr.bf16.mxu0 %v1451_v16  ;;  %v41_v35 = vld [vmem:[%s2141_s0] sm:$0xff]  ;;  %1458 = vmatpush3.bf16.msra.mxu1 %v1457_v28  ;;  %v42_v42 = vld [vmem:[%s2141_s0 + $0x8] sm:$0xff]  ;;  %v1467_v44 = vpack.c.bf16 %v348_v41, %v347_v40  ;;  %v331_v45 = vld [vmem:[%s2144_s3 + $0x30] sm:$0xff] }
   0xd   :  { %1460 = vmatprep.subr.bf16.mxu1 %v1459_v29  ;;  %v329_v38 = vld [vmem:[%s2144_s3 + $0x20] sm:$0xff]  ;;  %v332_v46 = vld [vmem:[%s2144_s3 + $0x38] sm:$0xff] }
   0xe   :  { %v1465_v43 = vpack.c.bf16 %v330_v39, %v329_v38 }
   0xf   :  { %1454 = vmatpush1.bf16.msra.mxu0 %v1453_v19 }
  0x10   :  { %144 = vmatprep.subr.mxu0 %v70_v20  ;;  %1462 = vmatpush3.bf16.msra.mxu1 %v1461_v36 }
  0x11   :  { %1464 = vmatprep.subr.bf16.mxu1 %v1463_v37 }
  0x13   :  { %145 = vmatpush1.msra.mxu0 %v69_v33 }
  0x14   :  { %1175 = vmatmul.mubr.msk.f32.vlgmr.msra.gmra.mrb[0].mxu0 %vm83_vm0, %v41_v35 }
  0x15   :  { %202 = vmatprep.mubr.f32.mxu0 %v1572_v8 }
  0x16   :  { %18 = vsyncpa [#allocation4], 0  ;;  %v349_v47 = vld [vmem:[%s2144_s3 + $0xc0] sm:$0xff]  ;;  %v350_v48 = vld [vmem:[%s2144_s3 + $0xc8] sm:$0xff]  ;;  %1466 = vmatpush3.bf16.msra.mxu1 %v1465_v43  ;;  %v1469_v50 = vpack.c.bf16 %v332_v46, %v331_v45  ;;  %v73_v43 = vlaneseq  ;;  %vm724_vm1 = vcmask 523264   ;;  %vm957_vm2 = vcmask 261120  }
  0x17   :  { %v43_v49 = vld [vmem:[%s2141_s0 + $0x10] sm:$0xff]  ;;  %1468 = vmatprep.subr.bf16.mxu1 %v1467_v44  ;;  %v1471_v51 = vpack.c.bf16 %v350_v48, %v349_v47  ;;  %v333_v52 = vld [vmem:[%s2144_s3 + $0x40] sm:$0xff]  ;;  %v334_v53 = vld [vmem:[%s2144_s3 + $0x48] sm:$0xff]  ;;  %vm1059_vm3 = vcmask 130112   ;;  %vm1066_vm4 = vcmask 195712   ;;  %vm1073_vm5 = vcmask 261312  }
  0x18   :  { %1176 = vmatmul.mubr.msk.f32.gmra.mrb[2].mxu0 %vm83_vm0, %v42_v42  ;;  %v351_v54 = vld [vmem:[%s2144_s3 + $0xd0] sm:$0xff]  ;;  %v352_v55 = vld [vmem:[%s2144_s3 + $0xd8] sm:$0xff]  ;;  %v1473_v57 = vpack.c.bf16 %v334_v53, %v333_v52  ;;  %v353_v61 = vld [vmem:[%s2144_s3 + $0xe0] sm:$0xff]  ;;  %v1899_v44 = vshrl.u32 %v73_v43, 7  ;;  %vm1080_vm6 = vcmask 326912   ;;  %vm1087_vm7 = vcmask 392512  }
  0x19   :  { %208 = vmatprep.mubr.f32.mxu0 %v1572_v8  ;;  %v44_v56 = vld [vmem:[%s2141_s0 + $0x18] sm:$0xff]  ;;  %v1475_v58 = vpack.c.bf16 %v352_v55, %v351_v54  ;;  %v335_v59 = vld [vmem:[%s2144_s3 + $0x50] sm:$0xff]  ;;  %v354_v62 = vld [vmem:[%s2144_s3 + $0xe8] sm:$0xff]  ;;  %vm1094_vm8 = vcmask 458112   ;;  %vm1101_vm9 = vcmask 523712   ;;  %vm1108_vm10 = vcmask 589312  }
  0x1a   :  { %1470 = vmatpush3.bf16.msra.mxu1 %v1469_v50  ;;  %v336_v60 = vld [vmem:[%s2144_s3 + $0x58] sm:$0xff]  ;;  %v45_v63 = vld [vmem:[%s2141_s0 + $0x20] sm:$0xff]  ;;  %v1479_v1 = vpack.c.bf16 %v354_v62, %v353_v61  ;;  %v46_v2 = vld [vmem:[%s2141_s0 + $0x28] sm:$0xff]  ;;  %v75_v45 = vsub.s32 0, %v1899_v44  ;;  %v79_v47 = vsub.s32 1, %v1899_v44  ;;  %vm1115_vm11 = vcmask 654912  }
  0x1b   :  { %1472 = vmatprep.subr.bf16.mxu1 %v1471_v51  ;;  %v1477_v0 = vpack.c.bf16 %v336_v60, %v335_v59  ;;  %v47_v3 = vld [vmem:[%s2141_s0 + $0x30] sm:$0xff]  ;;  %v48_v4 = vld [vmem:[%s2141_s0 + $0x38] sm:$0xff]  ;;  %v49_v5 = vld [vmem:[%s2141_s0 + $0x40] sm:$0xff]  ;;  %vm1122_vm12 = vcmask 720512   ;;  %vm1129_vm13 = vcmask 786112   ;;  %vm1136_vm14 = vcmask 851712  }
  0x1c   :  { %1177 = vmatmul.mubr.msk.f32.gmra.mrb[4].mxu0 %vm83_vm0, %v43_v49  ;;  %v50_v6 = vld [vmem:[%s2141_s0 + $0x48] sm:$0xff]  ;;  %v51_v7 = vld [vmem:[%s2141_s0 + $0x50] sm:$0xff]  ;;  %v52_v9 = vld [vmem:[%s2141_s0 + $0x58] sm:$0xff]  ;;  %vm1143_vm15 = vcmask 917312  }
  0x1d   :  { %214 = vmatprep.mubr.f32.mxu0 %v1572_v8  ;;  %v53_v10 = vld [vmem:[%s2141_s0 + $0x60] sm:$0xff]  ;;  %v54_v11 = vld [vmem:[%s2141_s0 + $0x68] sm:$0xff]  ;;  %v55_v12 = vld [vmem:[%s2141_s0 + $0x70] sm:$0xff] }
  0x1e   :  { %1474 = vmatpush3.bf16.msra.mxu1 %v1473_v57  ;;  %v56_v13 = vld [vmem:[%s2141_s0 + $0x78] sm:$0xff]  ;;  %v337_v14 = vld [vmem:[%s2144_s3 + $0x60] sm:$0xff]  ;;  %v338_v15 = vld [vmem:[%s2144_s3 + $0x68] sm:$0xff] }
  0x1f   :  { %1476 = vmatprep.subr.bf16.mxu1 %v1475_v58  ;;  %v1481_v16 = vpack.c.bf16 %v338_v15, %v337_v14  ;;  %v356_v17 = vld [vmem:[%s2144_s3 + $0xf8] sm:$0xff]  ;;  %v339_v19 = vld [vmem:[%s2144_s3 + $0x70] sm:$0xff]  ;;  %v525_v22 = vld [vmem:[%s2146_s5] sm:$0xff] }
  0x20   :  { %1178 = vmatmul.mubr.msk.f32.gmra.mrb[6].mxu0 %vm83_vm0, %v44_v56  ;;  %v340_v20 = vld [vmem:[%s2144_s3 + $0x78] sm:$0xff]  ;;  %v526_v23 = vld [vmem:[%s2146_s5 + $0x8] sm:$0xff]  ;;  %v527_v24 = vld [vmem:[%s2146_s5 + $0x10] sm:$0xff] }
  0x21   :  { %220 = vmatprep.mubr.f32.mxu0 %v1572_v8  ;;  %v1485_v21 = vpack.c.bf16 %v340_v20, %v339_v19  ;;  %v1487_v25 = vpack.c.bf16 %v526_v23, %v525_v22  ;;  %v528_v26 = vld [vmem:[%s2146_s5 + $0x18] sm:$0xff]  ;;  %v529_v28 = vld [vmem:[%s2146_s5 + $0x20] sm:$0xff]  ;;  %v530_v29 = vld [vmem:[%s2146_s5 + $0x28] sm:$0xff] }
  0x22   :  { %1478 = vmatpush3.bf16.msra.mxu1 %v1477_v0  ;;  %v1491_v27 = vpack.c.bf16 %v528_v26, %v527_v24  ;;  %v1495_v30 = vpack.c.bf16 %v530_v29, %v529_v28  ;;  %v531_v31 = vld [vmem:[%s2146_s5 + $0x30] sm:$0xff]  ;;  %v532_v32 = vld [vmem:[%s2146_s5 + $0x38] sm:$0xff]  ;;  %v533_v34 = vld [vmem:[%s2146_s5 + $0x40] sm:$0xff] }
  0x23   :  { %1480 = vmatprep.subr.bf16.mxu1 %v1479_v1  ;;  %1488 = vmatprep.subr.bf16.mxu0 %v1487_v25  ;;  %v1499_v33 = vpack.c.bf16 %v532_v32, %v531_v31  ;;  %v534_v35 = vld [vmem:[%s2146_s5 + $0x48] sm:$0xff]  ;;  %v535_v37 = vld [vmem:[%s2146_s5 + $0x50] sm:$0xff]  ;;  %v536_v38 = vld [vmem:[%s2146_s5 + $0x58] sm:$0xff] }
  0x24   :  { %1179 = vmatmul.mubr.msk.f32.gmra.mrb[8].mxu0 %vm83_vm0, %v45_v63  ;;  %v1503_v36 = vpack.c.bf16 %v534_v35, %v533_v34  ;;  %v1507_v39 = vpack.c.bf16 %v536_v38, %v535_v37  ;;  %v537_v40 = vld [vmem:[%s2146_s5 + $0x60] sm:$0xff]  ;;  %v538_v41 = vld [vmem:[%s2146_s5 + $0x68] sm:$0xff] }
  0x25   :  { %226 = vmatprep.mubr.f32.mxu0 %v1572_v8  ;;  %1490 = vmatpush3.bf16.msra.mxu0 %v1487_v25  ;;  %v1511_v42 = vpack.c.bf16 %v538_v41, %v537_v40  ;;  %v71_v46 = vld [vmem:[%s2143_s2] sm:$0x3] }
  0x26   :  { %1482 = vmatpush3.bf16.msra.mxu1 %v1481_v16  ;;  %1492 = vmatprep.subr.bf16.mxu0 %v1491_v27  ;;  %v1908_v48 = vrot.slane %v71_v46, %v75_v45  ;;  %v1910_v49 = vrot.slane %v71_v46, %v79_v47 }
  0x28   :  { %1180 = vmatmul.mubr.msk.f32.gmra.mrb[10].mxu0 %vm83_vm0, %v46_v2 }
  0x29   :  { %232 = vmatprep.mubr.f32.mxu0 %v1572_v8  ;;  %1494 = vmatpush3.bf16.msra.mxu0 %v1491_v27 }
  0x2a   :  { %1496 = vmatprep.subr.bf16.mxu0 %v1495_v30 }
  0x2c   :  { %1181 = vmatmul.mubr.msk.f32.gmra.mrb[12].mxu0 %vm83_vm0, %v47_v3 }
  0x2d   :  { %238 = vmatprep.mubr.f32.mxu0 %v1572_v8  ;;  %1498 = vmatpush3.bf16.msra.mxu0 %v1495_v30 }
  0x2e   :  { %1500 = vmatprep.subr.bf16.mxu0 %v1499_v33 }
  0x30   :  { %1182 = vmatmul.mubr.msk.f32.gmra.mrb[14].mxu0 %vm83_vm0, %v48_v4 }
  0x31   :  { %244 = vmatprep.mubr.f32.mxu0 %v1572_v8  ;;  %1502 = vmatpush3.bf16.msra.mxu0 %v1499_v33 }
  0x32   :  { %1504 = vmatprep.subr.bf16.mxu0 %v1503_v36 }
  0x34   :  { %1183 = vmatmul.mubr.msk.f32.gmra.mrb[16].mxu0 %vm83_vm0, %v49_v5 }
  0x35   :  { %250 = vmatprep.mubr.f32.mxu0 %v1572_v8  ;;  %1506 = vmatpush3.bf16.msra.mxu0 %v1503_v36 }
  0x36   :  { %1508 = vmatprep.subr.bf16.mxu0 %v1507_v39 }
  0x38   :  { %1184 = vmatmul.mubr.msk.f32.gmra.mrb[18].mxu0 %vm83_vm0, %v50_v6 }
  0x39   :  { %256 = vmatprep.mubr.f32.mxu0 %v1572_v8  ;;  %1510 = vmatpush3.bf16.msra.mxu0 %v1507_v39 }
  0x3a   :  { %1512 = vmatprep.subr.bf16.mxu0 %v1511_v42 }
  0x3c   :  { %1185 = vmatmul.mubr.msk.f32.gmra.mrb[20].mxu0 %vm83_vm0, %v51_v7 }
  0x3d   :  { %262 = vmatprep.mubr.f32.mxu0 %v1572_v8  ;;  %1514 = vmatpush3.bf16.msra.mxu0 %v1511_v42 }
  0x40   :  { %1186 = vmatmul.mubr.msk.f32.gmra.mrb[22].mxu0 %vm83_vm0, %v52_v9 }
  0x41   :  { %268 = vmatprep.mubr.f32.mxu0 %v1572_v8 }
  0x44   :  { %1187 = vmatmul.mubr.msk.f32.gmra.mrb[24].mxu0 %vm83_vm0, %v53_v10 }
  0x45   :  { %274 = vmatprep.mubr.f32.mxu0 %v1572_v8 }
  0x48   :  { %1188 = vmatmul.mubr.msk.f32.gmra.mrb[26].mxu0 %vm83_vm0, %v54_v11 }
  0x49   :  { %280 = vmatprep.mubr.f32.mxu0 %v1572_v8 }
  0x4c   :  { %1189 = vmatmul.mubr.msk.f32.gmra.mrb[28].mxu0 %vm83_vm0, %v55_v12 }
  0x4d   :  { %286 = vmatprep.mubr.f32.mxu0 %v1572_v8  ;;  %v355_v8 = vld [vmem:[%s2144_s3 + $0xf0] sm:$0xff] }
  0x4e   :  { %v1483_v18 = vpack.c.bf16 %v356_v17, %v355_v8 }
  0x50   :  { %1190 = vmatmul.mubr.msk.f32.gmra.mrb[30].mxu0 %vm83_vm0, %v56_v13  ;;  %1484 = vmatprep.subr.bf16.mxu1 %v1483_v18  ;;  %vm1150_vm0 = vcmask 982912  }
  0x51   :  { %1486 = vmatpush3.bf16.msra.mxu1 %v1485_v21 }
  0xe7   :  { %v198_v50 = vpop.f32.mrb[0].mxu0 }
  0xe8   :  { %v199_v51 = vadd.f32 %v198_v50, %v1908_v48  ;;  %v200_v52 = vpop.f32.mrb[1].mxu0 }
  0xe9   :  { %v201_v53 = vadd.f32 %v200_v52, %v1910_v49 }
  0xea   :  { %v293_v56 = vmax.f32 %v199_v51, 0.0 }
  0xeb   :  { %v204_v54 = vpop.f32.mrb[2].mxu0  ;;  %v294_v55 = vmax.f32 %v201_v53, 0.0 }
  0xec   :  { %v205_v57 = vadd.f32 %v204_v54, %v1908_v48  ;;  %v206_v58 = vpop.f32.mrb[3].mxu0 }
  0xed   :  { %v207_v59 = vadd.f32 %v206_v58, %v1910_v49  ;;  %428 = vmatprep.mubr.f32.mxu1 %v294_v55 }
  0xee   :  { %429 = vmatmul.mubr.f32.vlgmr.msra.gmra.mrb[0].mxu1 %v293_v56  ;;  %v295_v62 = vmax.f32 %v205_v57, 0.0 }
  0xef   :  { %v296_v60 = vmax.f32 %v207_v59, 0.0  ;;  %v210_v61 = vpop.f32.mrb[4].mxu0 }
  0xf0   :  { %v211_v63 = vadd.f32 %v210_v61, %v1908_v48  ;;  %v212_v0 = vpop.f32.mrb[5].mxu0 }
  0xf1   :  { %v213_v1 = vadd.f32 %v212_v0, %v1910_v49  ;;  %433 = vmatprep.mubr.f32.mxu1 %v296_v60 }
  0xf2   :  { %434 = vmatmul.mubr.f32.gmra.mrb[2].mxu1 %v295_v62  ;;  %v297_v4 = vmax.f32 %v211_v63, 0.0 }
  0xf3   :  { %v298_v2 = vmax.f32 %v213_v1, 0.0  ;;  %v216_v3 = vpop.f32.mrb[6].mxu0 }
  0xf4   :  { %v217_v5 = vadd.f32 %v216_v3, %v1908_v48  ;;  %v218_v6 = vpop.f32.mrb[7].mxu0 }
  0xf5   :  { %v219_v7 = vadd.f32 %v218_v6, %v1910_v49  ;;  %438 = vmatprep.mubr.f32.mxu1 %v298_v2 }
  0xf6   :  { %439 = vmatmul.mubr.f32.gmra.mrb[4].mxu1 %v297_v4  ;;  %v299_v11 = vmax.f32 %v217_v5, 0.0 }
  0xf7   :  { %v300_v9 = vmax.f32 %v219_v7, 0.0  ;;  %v222_v10 = vpop.f32.mrb[8].mxu0 }
  0xf8   :  { %v223_v12 = vadd.f32 %v222_v10, %v1908_v48  ;;  %v224_v13 = vpop.f32.mrb[9].mxu0 }
  0xf9   :  { %v225_v14 = vadd.f32 %v224_v13, %v1910_v49  ;;  %443 = vmatprep.mubr.f32.mxu1 %v300_v9 }
  0xfa   :  { %444 = vmatmul.mubr.f32.gmra.mrb[6].mxu1 %v299_v11  ;;  %v301_v8 = vmax.f32 %v223_v12, 0.0 }
  0xfb   :  { %v302_v15 = vmax.f32 %v225_v14, 0.0  ;;  %v228_v16 = vpop.f32.mrb[10].mxu0 }
  0xfc   :  { %v229_v17 = vadd.f32 %v228_v16, %v1908_v48  ;;  %v230_v18 = vpop.f32.mrb[11].mxu0 }
  0xfd   :  { %v231_v19 = vadd.f32 %v230_v18, %v1910_v49  ;;  %448 = vmatprep.mubr.f32.mxu1 %v302_v15 }
  0xfe   :  { %449 = vmatmul.mubr.f32.gmra.mrb[8].mxu1 %v301_v8  ;;  %v303_v22 = vmax.f32 %v229_v17, 0.0 }
  0xff   :  { %v304_v20 = vmax.f32 %v231_v19, 0.0  ;;  %v234_v21 = vpop.f32.mrb[12].mxu0 }
 0x100   :  { %v235_v23 = vadd.f32 %v234_v21, %v1908_v48  ;;  %v236_v24 = vpop.f32.mrb[13].mxu0 }
 0x101   :  { %v237_v25 = vadd.f32 %v236_v24, %v1910_v49  ;;  %453 = vmatprep.mubr.f32.mxu1 %v304_v20  ;;  %v540_v24 = vld [vmem:[%s2146_s5 + $0x78] sm:$0xff] }
 0x102   :  { %v305_v26 = vmax.f32 %v235_v23, 0.0  ;;  %454 = vmatmul.mubr.f32.gmra.mrb[10].mxu1 %v303_v22  ;;  %v539_v23 = vld [vmem:[%s2146_s5 + $0x70] sm:$0xff] }
 0x103   :  { %v306_v27 = vmax.f32 %v237_v25, 0.0  ;;  %v240_v28 = vpop.f32.mrb[14].mxu0  ;;  %v1515_v25 = vpack.c.bf16 %v540_v24, %v539_v23 }
 0x104   :  { %v241_v29 = vadd.f32 %v240_v28, %v1908_v48  ;;  %v242_v30 = vpop.f32.mrb[15].mxu0  ;;  %v712_v28 = vld [vmem:[%s2148_s7 + $0x18] sm:$0xff] }
 0x105   :  { %v243_v31 = vadd.f32 %v242_v30, %v1910_v49  ;;  %458 = vmatprep.mubr.f32.mxu1 %v306_v27  ;;  %1516 = vmatprep.subr.bf16.mxu0 %v1515_v25  ;;  %v713_v30 = vld [vmem:[%s2148_s7 + $0x20] sm:$0xff] }
 0x106   :  { %v307_v32 = vmax.f32 %v241_v29, 0.0  ;;  %459 = vmatmul.mubr.f32.gmra.mrb[12].mxu1 %v305_v26  ;;  %1518 = vmatpush3.bf16.msra.mxu0 %v1515_v25  ;;  %v711_v26 = vld [vmem:[%s2148_s7 + $0x10] sm:$0xff] }
 0x107   :  { %v308_v33 = vmax.f32 %v243_v31, 0.0  ;;  %v246_v34 = vpop.f32.mrb[16].mxu0  ;;  %v1523_v29 = vpack.c.bf16 %v712_v28, %v711_v26  ;;  %v714_v31 = vld [vmem:[%s2148_s7 + $0x28] sm:$0xff] }
 0x108   :  { %v247_v35 = vadd.f32 %v246_v34, %v1908_v48  ;;  %v248_v36 = vpop.f32.mrb[17].mxu0  ;;  %v1971_v34 = vld [vmem:[%s2145_s4] ss:$0 sm:$0xff] }
 0x109   :  { %v249_v37 = vadd.f32 %v248_v36, %v1910_v49  ;;  %463 = vmatprep.mubr.f32.mxu1 %v308_v33 }
 0x10a   :  { %v309_v38 = vmax.f32 %v247_v35, 0.0  ;;  %464 = vmatmul.mubr.f32.gmra.mrb[14].mxu1 %v307_v32  ;;  %v1527_v32 = vpack.c.bf16 %v714_v31, %v713_v30 }
 0x10b   :  { %v310_v39 = vmax.f32 %v249_v37, 0.0  ;;  %v252_v40 = vpop.f32.mrb[18].mxu0 }
 0x10c   :  { %v253_v41 = vadd.f32 %v252_v40, %v1908_v48  ;;  %v254_v42 = vpop.f32.mrb[19].mxu0 }
 0x10d   :  { %v255_v46 = vadd.f32 %v254_v42, %v1910_v49  ;;  %468 = vmatprep.mubr.f32.mxu1 %v310_v39 }
 0x10e   :  { %v311_v47 = vmax.f32 %v253_v41, 0.0  ;;  %469 = vmatmul.mubr.f32.gmra.mrb[16].mxu1 %v309_v38 }
 0x10f   :  { %v312_v50 = vmax.f32 %v255_v46, 0.0  ;;  %v258_v51 = vpop.f32.mrb[20].mxu0 }
 0x110   :  { %v259_v52 = vadd.f32 %v258_v51, %v1908_v48  ;;  %v260_v53 = vpop.f32.mrb[21].mxu0 }
 0x111   :  { %v261_v54 = vadd.f32 %v260_v53, %v1910_v49  ;;  %473 = vmatprep.mubr.f32.mxu1 %v312_v50 }
 0x112   :  { %v313_v55 = vmax.f32 %v259_v52, 0.0  ;;  %474 = vmatmul.mubr.f32.gmra.mrb[18].mxu1 %v311_v47 }
 0x113   :  { %v314_v56 = vmax.f32 %v261_v54, 0.0  ;;  %v264_v57 = vpop.f32.mrb[22].mxu0 }
 0x114   :  { %v265_v58 = vadd.f32 %v264_v57, %v1908_v48  ;;  %v266_v59 = vpop.f32.mrb[23].mxu0 }
 0x115   :  { %v267_v60 = vadd.f32 %v266_v59, %v1910_v49  ;;  %478 = vmatprep.mubr.f32.mxu1 %v314_v56 }
 0x116   :  { %v315_v61 = vmax.f32 %v265_v58, 0.0  ;;  %479 = vmatmul.mubr.f32.gmra.mrb[20].mxu1 %v313_v55 }
 0x117   :  { %v316_v62 = vmax.f32 %v267_v60, 0.0  ;;  %v270_v63 = vpop.f32.mrb[24].mxu0 }
 0x118   :  { %v271_v0 = vadd.f32 %v270_v63, %v1908_v48  ;;  %v272_v1 = vpop.f32.mrb[25].mxu0 }
 0x119   :  { %v273_v2 = vadd.f32 %v272_v1, %v1910_v49  ;;  %483 = vmatprep.mubr.f32.mxu1 %v316_v62 }
 0x11a   :  { %v317_v3 = vmax.f32 %v271_v0, 0.0  ;;  %484 = vmatmul.mubr.f32.gmra.mrb[22].mxu1 %v315_v61 }
 0x11b   :  { %v318_v4 = vmax.f32 %v273_v2, 0.0  ;;  %v276_v5 = vpop.f32.mrb[26].mxu0 }
 0x11c   :  { %v277_v6 = vadd.f32 %v276_v5, %v1908_v48  ;;  %v278_v7 = vpop.f32.mrb[27].mxu0 }
 0x11d   :  { %v279_v9 = vadd.f32 %v278_v7, %v1910_v49  ;;  %488 = vmatprep.mubr.f32.mxu1 %v318_v4 }
 0x11e   :  { %v319_v10 = vmax.f32 %v277_v6, 0.0  ;;  %489 = vmatmul.mubr.f32.gmra.mrb[24].mxu1 %v317_v3 }
 0x11f   :  { %v320_v11 = vmax.f32 %v279_v9, 0.0  ;;  %v282_v12 = vpop.f32.mrb[28].mxu0 }
 0x120   :  { %v283_v13 = vadd.f32 %v282_v12, %v1908_v48  ;;  %v284_v14 = vpop.f32.mrb[29].mxu0 }
 0x121   :  { %v285_v15 = vadd.f32 %v284_v14, %v1910_v49  ;;  %493 = vmatprep.mubr.f32.mxu1 %v320_v11 }
 0x122   :  { %v321_v16 = vmax.f32 %v283_v13, 0.0  ;;  %494 = vmatmul.mubr.f32.gmra.mrb[26].mxu1 %v319_v10 }
 0x123   :  { %v322_v8 = vmax.f32 %v285_v15, 0.0  ;;  %v288_v17 = vpop.f32.mrb[30].mxu0 }
 0x124   :  { %v289_v18 = vadd.f32 %v288_v17, %v1908_v48  ;;  %v290_v19 = vpop.f32.mrb[31].mxu0  ;;  %v709_v48 = vld [vmem:[%s2148_s7] sm:$0xff] }
 0x125   :  { %v291_v20 = vadd.f32 %v290_v19, %v1910_v49  ;;  %498 = vmatprep.mubr.f32.mxu1 %v322_v8  ;;  %v710_v49 = vld [vmem:[%s2148_s7 + $0x8] sm:$0xff] }
 0x126   :  { %v323_v21 = vmax.f32 %v289_v18, 0.0  ;;  %499 = vmatmul.mubr.f32.gmra.mrb[28].mxu1 %v321_v16  ;;  %v1519_v27 = vpack.c.bf16 %v710_v49, %v709_v48 }
 0x127   :  { %v324_v22 = vmax.f32 %v291_v20, 0.0 }
 0x128   :  { %1535 = vmatprep.subr.bf16.mxu1 %v1519_v27  ;;  %1520 = vmatprep.subr.bf16.mxu0 %v1519_v27 }
 0x129   :  { %503 = vmatprep.mubr.f32.mxu1 %v324_v22  ;;  %1539 = vmatpush3.bf16.msra.mxu1 %v1519_v27 }
 0x12a   :  { %504 = vmatmul.mubr.f32.gmra.mrb[30].mxu1 %v323_v21  ;;  %1536 = vmatprep.subr.bf16.mxu1 %v1523_v29 }
 0x12d   :  { %1540 = vmatpush3.bf16.msra.mxu1 %v1523_v29 }
 0x12e   :  { %1537 = vmatprep.subr.bf16.mxu1 %v1527_v32 }
 0x131   :  { %1541 = vmatpush3.bf16.msra.mxu1 %v1527_v32 }
 0x1c1   :  { %v1243_v33 = vpop.f32.mrb[0].mxu1 }
 0x1c2   :  { %v1244_v35 = vpop.f32.mrb[1].mxu1 }
 0x1c3   :  { %v1245_v36 = vadd.f32 %v1244_v35, %v1243_v33 }
 0x1c5   :  { %v431_v37 = vadd.f32 %v1245_v36, %v1971_v34  ;;  %v1246_v38 = vpop.f32.mrb[2].mxu1 }
 0x1c6   :  { %v1247_v39 = vpop.f32.mrb[3].mxu1 }
 0x1c7   :  { %v509_v40 = vmax.f32 %v431_v37, 0.0  ;;  %v1248_v41 = vadd.f32 %v1247_v39, %v1246_v38 }
 0x1c9   :  { %v436_v42 = vadd.f32 %v1248_v41, %v1971_v34  ;;  %v1249_v46 = vpop.f32.mrb[4].mxu1  ;;  %1379 = vmatprep.mubr.f32.mxu0 %v509_v40 }
 0x1ca   :  { %v1250_v47 = vpop.f32.mrb[5].mxu1 }
 0x1cb   :  { %v510_v50 = vmax.f32 %v436_v42, 0.0  ;;  %v1251_v51 = vadd.f32 %v1250_v47, %v1249_v46 }
 0x1cd   :  { %v441_v52 = vadd.f32 %v1251_v51, %v1971_v34  ;;  %v1252_v53 = vpop.f32.mrb[6].mxu1  ;;  %1380 = vmatmul.mubr.f32.vlgmr.msra.gmra.mrb[32].mxu0 %v510_v50 }
 0x1ce   :  { %v1253_v54 = vpop.f32.mrb[7].mxu1  ;;  %1522 = vmatpush3.bf16.msra.mxu0 %v1519_v27 }
 0x1cf   :  { %v511_v55 = vmax.f32 %v441_v52, 0.0  ;;  %v1254_v56 = vadd.f32 %v1253_v54, %v1252_v53  ;;  %1524 = vmatprep.subr.bf16.mxu0 %v1523_v29 }
 0x1d1   :  { %v446_v57 = vadd.f32 %v1254_v56, %v1971_v34  ;;  %v1255_v58 = vpop.f32.mrb[8].mxu1  ;;  %1382 = vmatprep.mubr.f32.mxu0 %v511_v55 }
 0x1d2   :  { %v1256_v59 = vpop.f32.mrb[9].mxu1  ;;  %1526 = vmatpush3.bf16.msra.mxu0 %v1523_v29 }
 0x1d3   :  { %v512_v60 = vmax.f32 %v446_v57, 0.0  ;;  %v1257_v61 = vadd.f32 %v1256_v59, %v1255_v58  ;;  %1528 = vmatprep.subr.bf16.mxu0 %v1527_v32  ;;  %v715_v59 = vld [vmem:[%s2148_s7 + $0x30] sm:$0xff] }
 0x1d5   :  { %v451_v62 = vadd.f32 %v1257_v61, %v1971_v34  ;;  %v1258_v63 = vpop.f32.mrb[10].mxu1  ;;  %1383 = vmatmul.mubr.f32.gmra.mrb[34].mxu0 %v512_v60  ;;  %v716_v60 = vld [vmem:[%s2148_s7 + $0x38] sm:$0xff] }
 0x1d6   :  { %v1259_v0 = vpop.f32.mrb[11].mxu1  ;;  %1530 = vmatpush3.bf16.msra.mxu0 %v1527_v32  ;;  %v1531_v61 = vpack.c.bf16 %v716_v60, %v715_v59 }
 0x1d7   :  { %v513_v1 = vmax.f32 %v451_v62, 0.0  ;;  %v1260_v2 = vadd.f32 %v1259_v0, %v1258_v63 }
 0x1d8   :  { %1532 = vmatprep.subr.bf16.mxu0 %v1531_v61  ;;  %1538 = vmatprep.subr.bf16.mxu1 %v1531_v61 }
 0x1d9   :  { %v456_v3 = vadd.f32 %v1260_v2, %v1971_v34  ;;  %1385 = vmatprep.mubr.f32.mxu0 %v513_v1  ;;  %v1261_v4 = vpop.f32.mrb[12].mxu1  ;;  %1542 = vmatpush3.bf16.msra.mxu1 %v1531_v61 }
 0x1da   :  { %v1262_v5 = vpop.f32.mrb[13].mxu1  ;;  %1534 = vmatpush3.bf16.msra.mxu0 %v1531_v61 }
 0x1db   :  { %v514_v6 = vmax.f32 %v456_v3, 0.0  ;;  %v1263_v7 = vadd.f32 %v1262_v5, %v1261_v4 }
 0x1dd   :  { %v461_v9 = vadd.f32 %v1263_v7, %v1971_v34  ;;  %v1264_v10 = vpop.f32.mrb[14].mxu1  ;;  %1386 = vmatmul.mubr.f32.gmra.mrb[36].mxu0 %v514_v6 }
 0x1de   :  { %v1265_v11 = vpop.f32.mrb[15].mxu1 }
 0x1df   :  { %v515_v12 = vmax.f32 %v461_v9, 0.0  ;;  %v1266_v13 = vadd.f32 %v1265_v11, %v1264_v10 }
 0x1e1   :  { %v466_v14 = vadd.f32 %v1266_v13, %v1971_v34  ;;  %v1267_v15 = vpop.f32.mrb[16].mxu1  ;;  %1388 = vmatprep.mubr.f32.mxu0 %v515_v12 }
 0x1e2   :  { %v1268_v16 = vpop.f32.mrb[17].mxu1 }
 0x1e3   :  { %v516_v8 = vmax.f32 %v466_v14, 0.0  ;;  %v1269_v17 = vadd.f32 %v1268_v16, %v1267_v15 }
 0x1e5   :  { %v471_v18 = vadd.f32 %v1269_v17, %v1971_v34  ;;  %v1270_v19 = vpop.f32.mrb[18].mxu1  ;;  %1389 = vmatmul.mubr.f32.gmra.mrb[38].mxu0 %v516_v8 }
 0x1e6   :  { %v1271_v20 = vpop.f32.mrb[19].mxu1 }
 0x1e7   :  { %v517_v21 = vmax.f32 %v471_v18, 0.0  ;;  %v1272_v22 = vadd.f32 %v1271_v20, %v1270_v19 }
 0x1e9   :  { %v476_v23 = vadd.f32 %v1272_v22, %v1971_v34  ;;  %v1273_v24 = vpop.f32.mrb[20].mxu1  ;;  %1391 = vmatprep.mubr.f32.mxu0 %v517_v21 }
 0x1ea   :  { %v1274_v25 = vpop.f32.mrb[21].mxu1 }
 0x1eb   :  { %v518_v48 = vmax.f32 %v476_v23, 0.0  ;;  %v1275_v49 = vadd.f32 %v1274_v25, %v1273_v24 }
 0x1ed   :  { %v481_v26 = vadd.f32 %v1275_v49, %v1971_v34  ;;  %v1276_v27 = vpop.f32.mrb[22].mxu1  ;;  %1392 = vmatmul.mubr.f32.gmra.mrb[40].mxu0 %v518_v48 }
 0x1ee   :  { %v1277_v28 = vpop.f32.mrb[23].mxu1 }
 0x1ef   :  { %v519_v29 = vmax.f32 %v481_v26, 0.0  ;;  %v1278_v30 = vadd.f32 %v1277_v28, %v1276_v27 }
 0x1f1   :  { %v486_v31 = vadd.f32 %v1278_v30, %v1971_v34  ;;  %v1279_v32 = vpop.f32.mrb[24].mxu1  ;;  %1394 = vmatprep.mubr.f32.mxu0 %v519_v29 }
 0x1f2   :  { %v1280_v33 = vpop.f32.mrb[25].mxu1 }
 0x1f3   :  { %v520_v35 = vmax.f32 %v486_v31, 0.0  ;;  %v1281_v36 = vadd.f32 %v1280_v33, %v1279_v32 }
 0x1f5   :  { %v491_v37 = vadd.f32 %v1281_v36, %v1971_v34  ;;  %v1282_v38 = vpop.f32.mrb[26].mxu1  ;;  %1395 = vmatmul.mubr.f32.gmra.mrb[42].mxu0 %v520_v35 }
 0x1f6   :  { %v1283_v39 = vpop.f32.mrb[27].mxu1 }
 0x1f7   :  { %v521_v40 = vmax.f32 %v491_v37, 0.0  ;;  %v1284_v41 = vadd.f32 %v1283_v39, %v1282_v38 }
 0x1f9   :  { %v496_v42 = vadd.f32 %v1284_v41, %v1971_v34  ;;  %v1285_v46 = vpop.f32.mrb[28].mxu1  ;;  %1397 = vmatprep.mubr.f32.mxu0 %v521_v40 }
 0x1fa   :  { %v1286_v47 = vpop.f32.mrb[29].mxu1 }
 0x1fb   :  { %v522_v50 = vmax.f32 %v496_v42, 0.0  ;;  %v1287_v51 = vadd.f32 %v1286_v47, %v1285_v46 }
 0x1fd   :  { %v501_v52 = vadd.f32 %v1287_v51, %v1971_v34  ;;  %v1288_v53 = vpop.f32.mrb[30].mxu1  ;;  %1398 = vmatmul.mubr.f32.gmra.mrb[44].mxu0 %v522_v50  ;;  %v1573_v50 = vmov 0   ;;  %v2017_v51 = vld [vmem:[%s2149_s8] ss:$0 sm:$0xff]  ;;  %s1574_s8 = smov [#allocation3]  }
 0x1fe   :  { %v1289_v54 = vpop.f32.mrb[31].mxu1  ;;  %1546 = vset.pattern.permute.xlu1 %v1573_v50  ;;  %1547 = vset.pattern.permute.xlu0 %v1573_v50 }
 0x1ff   :  { %v523_v55 = vmax.f32 %v501_v52, 0.0  ;;  %v1290_v56 = vadd.f32 %v1289_v54, %v1288_v53 }
 0x201   :  { %v506_v57 = vadd.f32 %v1290_v56, %v1971_v34  ;;  %1400 = vmatprep.mubr.f32.mxu0 %v523_v55  ;;  %v1192_v34 = vld [vmem:[%s2147_s6] ss:$0 sm:$0xff] }
 0x202   :  { %v2024_v56 = vld [vmem:[%s2150_s9] ss:$0 sm:$0xff]  ;;  %s1167_s9 = sshll.u32 %s1574_s8, 4  ;;  %s1168_s9 = int_to_ptr.vmem [resolvable:$true] %s1167_s9 }
 0x203   :  { %v524_v58 = vmax.f32 %v506_v57, 0.0  ;;  %s1548_s2 = scalar_lea.vmem %s1168_s9, 16  ;;  %s1552_s25 = scalar_lea.vmem %s1168_s9, 32 }
 0x204   :  { %p1549_p0 = scmp.ne.s32.totalorder %s1168_s9, %s1548_s2  ;;  %p1553_p1 = scmp.lt.s32.totalorder %s1168_s9, %s1168_s9 }
 0x205   :  { %1401 = vmatmul.mubr.f32.gmra.mrb[46].mxu0 %v524_v58  ;;  %p1554_p2 = scmp.lt.s32.totalorder %s1552_s25, %s1548_s2 }
 0x207   :  { %p1555_p3 = por %p1554_p2, %p1553_p1 }
 0x209   :  { %p1556_p4 = pnand %p1555_p3, %p1549_p0 }
 0x2a0   :  { %v1381_v62 = vpop.f32.mrb[32].mxu0 }
 0x2a1   :  { %v620_v63 = vadd.f32 %v1381_v62, %v1192_v34  ;;  %v614_v0 = vpop.f32.mrb[33].mxu0 }
 0x2a2   :  { %v615_v1 = vadd.f32 %v1192_v34, %v614_v0 }
 0x2a3   :  { %v694_v3 = vmax.f32 %v620_v63, 0.0 }
 0x2a4   :  { %v693_v2 = vmax.f32 %v615_v1, 0.0 }
 0x2a6   :  { %1419 = vmatprep.mubr.msk.f32.mxu0 %vm724_vm1, %v693_v2 }
 0x2a7   :  { %1420 = vmatmul.mubr.msk.f32.vlgmr.msra.gmra.mrb[48].mxu0 %vm724_vm1, %v694_v3 }
 0x2a8   :  { %v1384_v4 = vpop.f32.mrb[34].mxu0 }
 0x2a9   :  { %v630_v5 = vadd.f32 %v1384_v4, %v1192_v34  ;;  %v624_v6 = vpop.f32.mrb[35].mxu0 }
 0x2aa   :  { %v625_v7 = vadd.f32 %v1192_v34, %v624_v6 }
 0x2ab   :  { %v696_v10 = vmax.f32 %v630_v5, 0.0 }
 0x2ac   :  { %v695_v9 = vmax.f32 %v625_v7, 0.0 }
 0x2ae   :  { %1422 = vmatprep.mubr.msk.f32.mxu0 %vm724_vm1, %v695_v9 }
 0x2af   :  { %1423 = vmatmul.mubr.msk.f32.gmra.mrb[50].mxu0 %vm724_vm1, %v696_v10 }
 0x2b0   :  { %v1387_v11 = vpop.f32.mrb[36].mxu0 }
 0x2b1   :  { %v640_v12 = vadd.f32 %v1387_v11, %v1192_v34  ;;  %v634_v13 = vpop.f32.mrb[37].mxu0 }
 0x2b2   :  { %v635_v14 = vadd.f32 %v1192_v34, %v634_v13 }
 0x2b3   :  { %v698_v16 = vmax.f32 %v640_v12, 0.0 }
 0x2b4   :  { %v697_v15 = vmax.f32 %v635_v14, 0.0 }
 0x2b6   :  { %1425 = vmatprep.mubr.msk.f32.mxu1 %vm724_vm1, %v697_v15 }
 0x2b7   :  { %1426 = vmatmul.mubr.msk.f32.vlgmr.msra.gmra.mrb[32].mxu1 %vm724_vm1, %v698_v16 }
 0x2b8   :  { %v1390_v8 = vpop.f32.mrb[38].mxu0 }
 0x2b9   :  { %v650_v17 = vadd.f32 %v1390_v8, %v1192_v34  ;;  %v644_v18 = vpop.f32.mrb[39].mxu0 }
 0x2ba   :  { %v645_v19 = vadd.f32 %v1192_v34, %v644_v18 }
 0x2bb   :  { %v700_v20 = vmax.f32 %v650_v17, 0.0 }
 0x2bc   :  { %v699_v21 = vmax.f32 %v645_v19, 0.0 }
 0x2be   :  { %1428 = vmatprep.mubr.msk.f32.mxu1 %vm724_vm1, %v699_v21 }
 0x2bf   :  { %1429 = vmatmul.mubr.msk.f32.gmra.mrb[34].mxu1 %vm724_vm1, %v700_v20 }
 0x2c0   :  { %v1393_v22 = vpop.f32.mrb[40].mxu0 }
 0x2c1   :  { %v660_v23 = vadd.f32 %v1393_v22, %v1192_v34  ;;  %v654_v24 = vpop.f32.mrb[41].mxu0 }
 0x2c2   :  { %v655_v25 = vadd.f32 %v1192_v34, %v654_v24 }
 0x2c3   :  { %v702_v48 = vmax.f32 %v660_v23, 0.0 }
 0x2c4   :  { %v701_v49 = vmax.f32 %v655_v25, 0.0 }
 0x2c6   :  { %1431 = vmatprep.mubr.msk.f32.mxu1 %vm724_vm1, %v701_v49 }
 0x2c7   :  { %1432 = vmatmul.mubr.msk.f32.gmra.mrb[36].mxu1 %vm724_vm1, %v702_v48 }
 0x2c8   :  { %v1396_v26 = vpop.f32.mrb[42].mxu0 }
 0x2c9   :  { %v670_v27 = vadd.f32 %v1396_v26, %v1192_v34  ;;  %v664_v28 = vpop.f32.mrb[43].mxu0 }
 0x2ca   :  { %v665_v29 = vadd.f32 %v1192_v34, %v664_v28 }
 0x2cb   :  { %v704_v30 = vmax.f32 %v670_v27, 0.0 }
 0x2cc   :  { %v703_v31 = vmax.f32 %v665_v29, 0.0 }
 0x2ce   :  { %1434 = vmatprep.mubr.msk.f32.mxu1 %vm724_vm1, %v703_v31 }
 0x2cf   :  { %1435 = vmatmul.mubr.msk.f32.gmra.mrb[38].mxu1 %vm724_vm1, %v704_v30 }
 0x2d0   :  { %v1399_v32 = vpop.f32.mrb[44].mxu0 }
 0x2d1   :  { %v680_v33 = vadd.f32 %v1399_v32, %v1192_v34  ;;  %v674_v35 = vpop.f32.mrb[45].mxu0 }
 0x2d2   :  { %v675_v36 = vadd.f32 %v1192_v34, %v674_v35 }
 0x2d3   :  { %v706_v37 = vmax.f32 %v680_v33, 0.0  ;;  %v1006_v33 = vld [vmem:[#allocation2] sm:$0x1] }
 0x2d4   :  { %v705_v38 = vmax.f32 %v675_v36, 0.0 }
 0x2d6   :  { %1437 = vmatprep.mubr.msk.f32.mxu1 %vm724_vm1, %v705_v38 }
 0x2d7   :  { %1438 = vmatmul.mubr.msk.f32.gmra.mrb[40].mxu1 %vm724_vm1, %v706_v37 }
 0x2d8   :  { %v1402_v39 = vpop.f32.mrb[46].mxu0 }
 0x2d9   :  { %v690_v40 = vadd.f32 %v1402_v39, %v1192_v34  ;;  %v684_v41 = vpop.f32.mrb[47].mxu0 }
 0x2da   :  { %v685_v42 = vadd.f32 %v1192_v34, %v684_v41 }
 0x2db   :  { %v708_v46 = vmax.f32 %v690_v40, 0.0 }
 0x2dc   :  { %v707_v47 = vmax.f32 %v685_v42, 0.0 }
 0x2de   :  { %1440 = vmatprep.mubr.msk.f32.mxu1 %vm724_vm1, %v707_v47 }
 0x2df   :  { %1441 = vmatmul.mubr.msk.f32.gmra.mrb[42].mxu1 %vm724_vm1, %v708_v46  ;;  %vm1157_vm1 = vcmask 1048512  }
 0x37a   :  { %v1421_v52 = vpop.f32.mrb[48].mxu0 }
 0x37b   :  { %v845_v53 = vadd.f32 %v1421_v52, %v2017_v51  ;;  %v839_v54 = vpop.f32.mrb[49].mxu0 }
 0x37c   :  { %v840_v55 = vadd.f32 %v2017_v51, %v839_v54 }
 0x37d   :  { %v919_v57 = vmax.f32 %v845_v53, 0.0 }
 0x37e   :  { %v918_v58 = vmax.f32 %v840_v55, 0.0 }
 0x37f   :  { %v942_v59 = vmul.f32 %v2024_v56, %v919_v57 }
 0x380   :  { %v941_v61 = vmul.f32 %v2024_v56, %v918_v58 }
 0x381   :  { %v961_v60 = vsel %vm957_vm2, %v942_v59, 0.0 }
 0x382   :  { %962 = vadd.xlane.f32.xlu0 %v961_v60  ;;  %v1424_v34 = vpop.f32.mrb[50].mxu0  ;;  %v958_v2 = vsel %vm957_vm2, %v941_v61, 0.0 }
 0x383   :  { %v855_v62 = vadd.f32 %v1424_v34, %v2017_v51  ;;  %v849_v63 = vpop.f32.mrb[51].mxu0 }
 0x384   :  { %v850_v0 = vadd.f32 %v2017_v51, %v849_v63 }
 0x385   :  { %v921_v1 = vmax.f32 %v855_v62, 0.0 }
 0x386   :  { %v920_v3 = vmax.f32 %v850_v0, 0.0  ;;  %959 = vadd.xlane.f32.xlu0 %v958_v2 }
 0x387   :  { %v944_v4 = vmul.f32 %v2024_v56, %v921_v1 }
 0x388   :  { %v943_v6 = vmul.f32 %v2024_v56, %v920_v3 }
 0x389   :  { %v967_v5 = vsel %vm957_vm2, %v944_v4, 0.0 }
 0x38a   :  { %v1427_v7 = vpop.f32.mrb[32].mxu1  ;;  %968 = vadd.xlane.f32.xlu1 %v967_v5  ;;  %v964_v13 = vsel %vm957_vm2, %v943_v6, 0.0 }
 0x38b   :  { %v865_v9 = vadd.f32 %v1427_v7, %v2017_v51  ;;  %v859_v10 = vpop.f32.mrb[33].mxu1 }
 0x38c   :  { %v860_v11 = vadd.f32 %v2017_v51, %v859_v10 }
 0x38d   :  { %v923_v12 = vmax.f32 %v865_v9, 0.0 }
 0x38e   :  { %v922_v14 = vmax.f32 %v860_v11, 0.0  ;;  %965 = vadd.xlane.f32.xlu1 %v964_v13 }
 0x38f   :  { %v946_v15 = vmul.f32 %v2024_v56, %v923_v12 }
 0x390   :  { %v945_v16 = vmul.f32 %v2024_v56, %v922_v14 }
 0x391   :  { %v973_v8 = vsel %vm957_vm2, %v946_v15, 0.0 }
 0x392   :  { %v1430_v17 = vpop.f32.mrb[34].mxu1  ;;  %974 = vadd.xlane.f32.xlu1 %v973_v8  ;;  %v970_v18 = vsel %vm957_vm2, %v945_v16, 0.0 }
 0x393   :  { %v875_v19 = vadd.f32 %v1430_v17, %v2017_v51  ;;  %971 = vadd.xlane.f32.xlu0 %v970_v18  ;;  %v869_v20 = vpop.f32.mrb[35].mxu1  ;;  %v2073_v17 = vand.u32 127, %v73_v43 }
 0x394   :  { %v870_v21 = vadd.f32 %v2017_v51, %v869_v20 }
 0x395   :  { %v925_v22 = vmax.f32 %v875_v19, 0.0  ;;  %v1054_v20 = vadd.s32 4294967288, %v2073_v17 }
 0x396   :  { %v924_v23 = vmax.f32 %v870_v21, 0.0  ;;  %v1061_v21 = vadd.s32 4294967280, %v2073_v17 }
 0x397   :  { %v948_v24 = vmul.f32 %v2024_v56, %v925_v22  ;;  %v1057_v43 = vsub.s32 %v1054_v20, %v1899_v44 }
 0x398   :  { %v947_v25 = vmul.f32 %v2024_v56, %v924_v23 }
 0x399   :  { %v979_v48 = vsel %vm957_vm2, %v948_v24, 0.0 }
 0x39a   :  { %v1433_v49 = vpop.f32.mrb[36].mxu1  ;;  %980 = vadd.xlane.f32.xlu0 %v979_v48  ;;  %v976_v28 = vsel %vm957_vm2, %v947_v25, 0.0  ;;  %v1052_v25 = vsub.s32 %v2073_v17, %v1899_v44 }
 0x39b   :  { %v885_v26 = vadd.f32 %v1433_v49, %v2017_v51  ;;  %v879_v27 = vpop.f32.mrb[37].mxu1  ;;  %v1064_v49 = vsub.s32 %v1061_v21, %v1899_v44 }
 0x39c   :  { %v880_v29 = vadd.f32 %v2017_v51, %v879_v27  ;;  %v1068_v27 = vadd.s32 4294967272, %v2073_v17 }
 0x39d   :  { %v927_v30 = vmax.f32 %v885_v26, 0.0 }
 0x39e   :  { %v926_v31 = vmax.f32 %v880_v29, 0.0  ;;  %977 = vadd.xlane.f32.xlu0 %v976_v28  ;;  %v1075_v29 = vadd.s32 4294967264, %v2073_v17 }
 0x39f   :  { %v950_v32 = vmul.f32 %v2024_v56, %v927_v30 }
 0x3a0   :  { %v949_v35 = vmul.f32 %v2024_v56, %v926_v31 }
 0x3a1   :  { %v985_v36 = vsel %vm957_vm2, %v950_v32, 0.0 }
 0x3a2   :  { %v1436_v37 = vpop.f32.mrb[38].mxu1  ;;  %986 = vadd.xlane.f32.xlu0 %v985_v36  ;;  %v982_v40 = vsel %vm957_vm2, %v949_v35, 0.0  ;;  %v1078_v36 = vsub.s32 %v1075_v29, %v1899_v44 }
 0x3a3   :  { %v895_v38 = vadd.f32 %v1436_v37, %v2017_v51  ;;  %v889_v39 = vpop.f32.mrb[39].mxu1  ;;  %1009 = vperm.xlu1 %1546, %v1006_v33   ;;  %v1071_v33 = vsub.s32 %v1068_v27, %v1899_v44  ;;  %v1082_v37 = vadd.s32 4294967256, %v2073_v17 }
 0x3a4   :  { %v890_v41 = vadd.f32 %v2017_v51, %v889_v39 }
 0x3a5   :  { %v929_v42 = vmax.f32 %v895_v38, 0.0 }
 0x3a6   :  { %v928_v46 = vmax.f32 %v890_v41, 0.0  ;;  %983 = vadd.xlane.f32.xlu0 %v982_v40  ;;  %v1089_v40 = vadd.s32 4294967248, %v2073_v17 }
 0x3a7   :  { %v952_v47 = vmul.f32 %v2024_v56, %v929_v42 }
 0x3a8   :  { %v951_v50 = vmul.f32 %v2024_v56, %v928_v46 }
 0x3a9   :  { %v991_v52 = vsel %vm957_vm2, %v952_v47, 0.0  ;;  %v1085_v47 = vsub.s32 %v1082_v37, %v1899_v44 }
 0x3aa   :  { %v1439_v53 = vpop.f32.mrb[40].mxu1  ;;  %v988_v54 = vsel %vm957_vm2, %v951_v50, 0.0 }
 0x3ab   :  { %v905_v55 = vadd.f32 %v1439_v53, %v2017_v51  ;;  %989 = vadd.xlane.f32.xlu0 %v988_v54  ;;  %v899_v57 = vpop.f32.mrb[41].mxu1  ;;  %v1103_v54 = vadd.s32 4294967232, %v2073_v17 }
 0x3ac   :  { %v900_v58 = vadd.f32 %v2017_v51, %v899_v57  ;;  %v1096_v57 = vadd.s32 4294967240, %v2073_v17 }
 0x3ad   :  { %v931_v59 = vmax.f32 %v905_v55, 0.0 }
 0x3ae   :  { %v930_v60 = vmax.f32 %v900_v58, 0.0 }
 0x3af   :  { %v954_v61 = vmul.f32 %v2024_v56, %v931_v59 }
 0x3b0   :  { %v953_v34 = vmul.f32 %v2024_v56, %v930_v60  ;;  %v1110_v60 = vadd.s32 4294967224, %v2073_v17 }
 0x3b1   :  { %v997_v62 = vsel %vm957_vm2, %v954_v61, 0.0  ;;  %v1117_v61 = vadd.s32 4294967216, %v2073_v17 }
 0x3b2   :  { %v1442_v63 = vpop.f32.mrb[42].mxu1  ;;  %998 = vadd.xlane.f32.xlu0 %v997_v62  ;;  %v994_v2 = vsel %vm957_vm2, %v953_v34, 0.0  ;;  %v1106_v62 = vsub.s32 %v1103_v54, %v1899_v44 }
 0x3b3   :  { %v915_v0 = vadd.f32 %v1442_v63, %v2017_v51  ;;  %v909_v1 = vpop.f32.mrb[43].mxu1 }
 0x3b4   :  { %v910_v3 = vadd.f32 %v2017_v51, %v909_v1 }
 0x3b5   :  { %v933_v4 = vmax.f32 %v915_v0, 0.0  ;;  %v1099_v0 = vsub.s32 %v1096_v57, %v1899_v44 }
 0x3b6   :  { %v932_v5 = vmax.f32 %v910_v3, 0.0  ;;  %995 = vadd.xlane.f32.xlu0 %v994_v2 }
 0x3b7   :  { %v956_v7 = vmul.f32 %v2024_v56, %v933_v4  ;;  %v1113_v4 = vsub.s32 %v1110_v60, %v1899_v44 }
 0x3b8   :  { %v955_v6 = vmul.f32 %v2024_v56, %v932_v5  ;;  %v1120_v5 = vsub.s32 %v1117_v61, %v1899_v44 }
 0x3b9   :  { %v1003_v10 = vsel %vm957_vm2, %v956_v7, 0.0 }
 0x3ba   :  { %v1000_v9 = vsel %vm957_vm2, %v955_v6, 0.0  ;;  %v1124_v6 = vadd.s32 4294967208, %v2073_v17 }
 0x3bb   :  { %1001 = vadd.xlane.f32.xlu0 %v1000_v9 }
 0x3bf   :  { %1004 = vadd.xlane.f32.xlu0 %v1003_v10 }
 0x3c7   :  { %992 = vadd.xlane.f32.xlu1 %v991_v52  ;;  %v1092_v52 = vsub.s32 %v1089_v40, %v1899_v44 }
 0x40f   :  { %v963_v11 = vpop.xlane.xlu0 %962 }
 0x413   :  { %v960_v12 = vpop.xlane.xlu0 %959 }
 0x417   :  { %v969_v13 = vpop.xlane.xlu1 %968 }
 0x41b   :  { %v966_v15 = vpop.xlane.xlu1 %965 }
 0x41f   :  { %v975_v16 = vpop.xlane.xlu1 %974 }
 0x420   :  { %v972_v14 = vpop.xlane.xlu0 %971 }
 0x423   :  { %v1010_v18 = vpop.permute.xlu1 %1009 }
 0x424   :  { %v2077_v19 = vrot.slane %v1010_v18, %v75_v45 }
 0x426   :  { %v1016_v23 = vadd.f32 %v2077_v19, %v960_v12  ;;  %v1017_v24 = vadd.f32 %v2077_v19, %v963_v11  ;;  %v1018_v48 = vadd.f32 %v2077_v19, %v966_v15  ;;  %v1019_v31 = vadd.f32 %v2077_v19, %v969_v13 }
 0x427   :  { %v981_v51 = vpop.xlane.xlu0 %980  ;;  %v1020_v38 = vadd.f32 %v2077_v19, %v972_v14  ;;  %v1021_v42 = vadd.f32 %v2077_v19, %v975_v16  ;;  %v1131_v11 = vadd.s32 4294967200, %v2073_v17  ;;  %v1138_v14 = vadd.s32 4294967192, %v2073_v17 }
 0x428   :  { %v1053_v45 = vrot.slane %v1016_v23, %v1052_v25  ;;  %v1058_v26 = vrot.slane %v1017_v24, %v1057_v43  ;;  %v1065_v30 = vrot.slane %v1018_v48, %v1064_v49  ;;  %v1072_v41 = vrot.slane %v1019_v31, %v1071_v33 }
 0x429   :  { %v1079_v50 = vrot.slane %v1020_v38, %v1078_v36  ;;  %v1086_v59 = vrot.slane %v1021_v42, %v1085_v47  ;;  %v1023_v1 = vadd.f32 %v2077_v19, %v981_v51  ;;  %v1145_v15 = vadd.s32 4294967184, %v2073_v17 }
 0x42a   :  { %v1060_v32 = vsel %vm1059_vm3, %v1058_v26, %v1053_v45  ;;  %v1152_v51 = vadd.s32 4294967176, %v2073_v17  ;;  %v1134_v21 = vsub.s32 %v1131_v11, %v1899_v44  ;;  %v1141_v25 = vsub.s32 %v1138_v14, %v1899_v44 }
 0x42b   :  { %v978_v8 = vpop.xlane.xlu0 %977  ;;  %v1067_v39 = vsel %vm1066_vm4, %v1065_v30, %v1060_v32  ;;  %v1100_v12 = vrot.slane %v1023_v1, %v1099_v0  ;;  %v1148_v48 = vsub.s32 %v1145_v15, %v1899_v44 }
 0x42c   :  { %v1074_v46 = vsel %vm1073_vm5, %v1072_v41, %v1067_v39  ;;  %v1022_v53 = vadd.f32 %v2077_v19, %v978_v8  ;;  %v1127_v8 = vsub.s32 %v1124_v6, %v1899_v44  ;;  %v1155_v45 = vsub.s32 %v1152_v51, %v1899_v44 }
 0x42d   :  { %v1081_v58 = vsel %vm1080_vm6, %v1079_v50, %v1074_v46 }
 0x42e   :  { %v1093_v34 = vrot.slane %v1022_v53, %v1092_v52  ;;  %v1088_v2 = vsel %vm1087_vm7, %v1086_v59, %v1081_v58 }
 0x42f   :  { %v987_v56 = vpop.xlane.xlu0 %986 }
 0x430   :  { %v1095_v7 = vsel %vm1094_vm8, %v1093_v34, %v1088_v2  ;;  %v1025_v13 = vadd.f32 %v2077_v19, %v987_v56 }
 0x431   :  { %v1102_v16 = vsel %vm1101_vm9, %v1100_v12, %v1095_v7 }
 0x432   :  { %v1114_v24 = vrot.slane %v1025_v13, %v1113_v4 }
 0x433   :  { %v984_v22 = vpop.xlane.xlu0 %983 }
 0x434   :  { %v1024_v63 = vadd.f32 %v2077_v19, %v984_v22 }
 0x436   :  { %v1107_v9 = vrot.slane %v1024_v63, %v1106_v62 }
 0x438   :  { %v990_v28 = vpop.xlane.xlu0 %989  ;;  %v1109_v18 = vsel %vm1108_vm10, %v1107_v9, %v1102_v16 }
 0x439   :  { %v1026_v10 = vadd.f32 %v2077_v19, %v990_v28  ;;  %v1116_v26 = vsel %vm1115_vm11, %v1114_v24, %v1109_v18 }
 0x43b   :  { %v1121_v20 = vrot.slane %v1026_v10, %v1120_v5 }
 0x43d   :  { %v1123_v29 = vsel %vm1122_vm12, %v1121_v20, %v1116_v26 }
 0x43f   :  { %v999_v35 = vpop.xlane.xlu0 %998 }
 0x440   :  { %v1029_v43 = vadd.f32 %v2077_v19, %v999_v35 }
 0x442   :  { %v1142_v31 = vrot.slane %v1029_v43, %v1141_v25 }
 0x443   :  { %v996_v55 = vpop.xlane.xlu0 %995 }
 0x444   :  { %v1028_v22 = vadd.f32 %v2077_v19, %v996_v55 }
 0x446   :  { %v1135_v30 = vrot.slane %v1028_v22, %v1134_v21 }
 0x448   :  { %v1002_v3 = vpop.xlane.xlu0 %1001 }
 0x449   :  { %v1030_v49 = vadd.f32 %v2077_v19, %v1002_v3 }
 0x44b   :  { %v1149_v33 = vrot.slane %v1030_v49, %v1148_v48 }
 0x44c   :  { %v1005_v23 = vpop.xlane.xlu0 %1004 }
 0x44d   :  { %v1031_v27 = vadd.f32 %v2077_v19, %v1005_v23 }
 0x44f   :  { %v1156_v44 = vrot.slane %v1031_v27, %v1155_v45 }
 0x454   :  { %v993_v56 = vpop.xlane.xlu1 %992 }
 0x455   :  { %v1027_v17 = vadd.f32 %v2077_v19, %v993_v56 }
 0x457   :  { %v1128_v28 = vrot.slane %v1027_v17, %v1127_v8 }
 0x459   :  { %v1130_v32 = vsel %vm1129_vm13, %v1128_v28, %v1123_v29 }
 0x45a   :  { %v1137_v35 = vsel %vm1136_vm14, %v1135_v30, %v1130_v32 }
 0x45b   :  { %v1144_v36 = vsel %vm1143_vm15, %v1142_v31, %v1137_v35 }
 0x45c   :  { %v1151_v37 = vsel %vm1150_vm0, %v1149_v33, %v1144_v36 }
 0x45d   :  { %v1158_v38 = vsel %vm1157_vm1, %v1156_v44, %v1151_v37 }
 0x45e   :  { %1160 = vst [vmem:[#allocation3] sm:$0x1] %v1158_v38 }
 0x45f   :  { %1559 = shalt.err (!%p1556_p4)
}
 0x460   :  { %s1560_s27 = scalar_lea.hbm %s2152_s11, 16 }
 0x461   :  { %p1561_p5 = scmp.ne.s32.totalorder %s2152_s11, %s1560_s27  ;;  %p1564_p6 = scmp.lt.u32.totalorder %s1560_s27, %s2152_s11 }
 0x463   :  { %p1566_p7 = pnand %p1564_p6, %p1561_p5 }
 0x465   :  { %1569 = shalt.err (!%p1566_p7)
}
 0x466   :  { %1170 = dma.vmem_to_hbm [thread:$0]  %s1168_s9, 16, %s2152_s11, [#allocation4]  }
 0x467   :  { %1570 = dma.done.wait [#allocation4], 16  }
 0x468   :  { %1571 = vsyncadd [#allocation4], 4294967280 }
 0x469   :  { %1174 = vsyncpa [#allocation4], 1 }

</bundles_post_ra>
